<compile_context>
chip_gen: v7x
topology: tpu7x:2x2x1
jax: 0.10.0
libtpu: 0.0.40
codegen_flags: <defaults>
</compile_context>

<pallas_src>
import numpy as np
import jax
import jax.numpy as jnp
from jax.experimental import pallas as pl
from jax.experimental.pallas import tpu as pltpu


# ------------------------------------------------------------------ kernels --

def _make_vpu_kernel(C: int):
    """Tiny-C path (C < 8): MXU would be <1% utilized, so use VPU FMAs.

    Weight scalars are read from SMEM; each output row is stored directly
    (no concatenate -> no sublane-placement copies, no extra (C,T) temp)."""
    def kernel(w_ref, x_ref, o_ref):
        # w_ref: (C, C) in SMEM; x_ref / o_ref: (Nb, C, T) in VMEM.
        x = x_ref[...]                                  # (Nb, C, T)
        for o in range(C):
            acc = w_ref[o, 0] * x[:, 0:1, :]            # (Nb, 1, T)
            for c in range(1, C):
                acc = acc + w_ref[o, c] * x[:, c:c + 1, :]
            o_ref[:, o:o + 1, :] = acc.astype(o_ref.dtype)
    return kernel


def _mxu_kernel(w_ref, x_ref, o_ref):
    """General path: per image, a (C,C) x (C,T) MXU matmul, f32 accumulation.

    Operands stay in the input dtype: the kernel is HBM-bound, so a bf16 cast
    would add VPU work and precision loss without reducing bytes moved."""
    w = w_ref[...]                                      # (C, C), resident in VMEM
    nb = x_ref.shape[0]
    for b in range(nb):                                 # nb is static (usually 1)
        z = jnp.dot(w, x_ref[b], preferred_element_type=jnp.float32)
        o_ref[b] = z.astype(o_ref.dtype)


# -------------------------------------------------------------- tile sizing --

_LANE = 128
_MAX_TILE_LANES = 16384     # 8K-16K-lane tiles amortize the ~0.35us/step overhead


def _vmem_budget_bytes():
    """Generation-aware budgets: (buffer budget, scoped-VMEM limit)."""
    try:
        cap = int(pltpu.get_tpu_info().vmem_capacity_bytes)
    except Exception:
        cap = 64 * 2 ** 20                  # conservative fallback (v7x-sized)
    budget = int(cap * 0.625)               # ~40 MiB @ 64 MiB (v7x), ~80 MiB @ 128 MiB
    limit = int(cap * 0.75)                 # headroom for compiler scratch
    return budget, limit


def _pick_blocking(N, C, HW, itemsize, budget_bytes):
    """Choose (Nb images per step, T pixels per step).

    2 input + 2 output pipelined blocks + the weight must fit the budget."""
    w_bytes = 2 * C * C * 4
    avail = max(budget_bytes - w_bytes, 4 * C * _LANE * itemsize)
    per_lane = 4 * C * itemsize             # bytes per lane per image (4 buffers)

    # Small images, several of them: block multiple images per grid step.
    if HW <= 4096 and N > 1:
        nb = max(1, min(N, avail // (per_lane * HW)))
        if nb >= N:                         # keep >= 2 grid programs (v7x megacore)
            nb = -(-N // 2)
        return int(nb), int(HW)

    # Otherwise tile the pixel axis with the fattest lane-dense tile that fits.
    cap = min(_MAX_TILE_LANES, avail // per_lane)
    cap = max(_LANE, (cap // _LANE) * _LANE)
    if HW <= cap:
        T = HW                              # full-extent block: always legal
        if N == 1 and HW > _LANE:           # keep >= 2 grid programs (v7x megacore)
            half = -(-HW // 2)
            T = -(-half // _LANE) * _LANE   # round up to a lane multiple
        return 1, int(T)
    return 1, int(cap)                      # ragged last block: masked on store


# ------------------------------------------------------------------ wrapper --

def invertible_conv1x1(x, weight, logdet=None, reverse=False):
    """Forward/reverse of InvertibleConv1x1.

    x:      (N, C, H, W) float32 (NCHW, like the PyTorch module).
    weight: (C, C) float32.
    Returns (z, logdet):
        forward:  z = conv2d(x, W.view(C,C,1,1)),       logdet + slogdet(W)[1]*H*W
        reverse:  z = conv2d(x, inv(W).view(C,C,1,1)),  logdet - slogdet(W)[1]*H*W
    """
    N, C, H, W = x.shape
    HW = H * W

    # Tiny CxC linear-algebra glue stays in plain JAX.
    _, logabsdet = jnp.linalg.slogdet(weight)
    dlogdet = logabsdet * HW
    if reverse:
        w = jnp.linalg.inv(weight)
        # TODO(synk): SRFlow inverts the weight in float64; without x64 enabled we
        # tighten the f32 inverse with one Newton-Schulz refinement step instead.
        eye = jnp.eye(C, dtype=weight.dtype)
        w = w @ (2.0 * eye - weight @ w)
    else:
        w = weight

    x_flat = x.reshape(N, C, HW)

    budget, gen_limit = _vmem_budget_bytes()
    Nb, T = _pick_blocking(N, C, HW, x.dtype.itemsize, budget)
    grid = (pl.cdiv(N, Nb), pl.cdiv(HW, T))

    xmap = lambda b, p: (b, 0, p)
    x_spec = pl.BlockSpec((Nb, C, T), xmap)
    o_spec = pl.BlockSpec((Nb, C, T), xmap)

    if C < 8:
        kernel = _make_vpu_kernel(C)
        w_spec = pl.BlockSpec(memory_space=pltpu.MemorySpace.SMEM)
    else:
        kernel = _mxu_kernel
        w_spec = pl.BlockSpec((C, C), lambda b, p: (0, 0))   # resident across grid

    need = 4 * Nb * C * T * x.dtype.itemsize + 2 * C * C * 4
    vmem_limit = int(min(max(2 * need, 32 * 2 ** 20), gen_limit))

    z_flat = pl.pallas_call(
        kernel,
        out_shape=jax.ShapeDtypeStruct((N, C, HW), x.dtype),
        grid_spec=pltpu.PrefetchScalarGridSpec(
            num_scalar_prefetch=0,
            grid=grid,
            in_specs=[w_spec, x_spec],
            out_specs=o_spec,
        ),
        compiler_params=pltpu.CompilerParams(
            dimension_semantics=("parallel", "parallel"),
            vmem_limit_bytes=vmem_limit,
        ),
    )(w, x_flat)

    z = z_flat.reshape(N, C, H, W)

    if logdet is not None:
        logdet = logdet + dlogdet if not reverse else logdet - dlogdet
    return z, logdet


# --------------------------------------------------------------------- demo --

if __name__ == "__main__":
    key = jax.random.PRNGKey(0)

    def orthogonal_weight(c, seed):
        # Mirrors the module's __init__: QR of a Gaussian matrix.
        rng = np.random.RandomState(seed)
        return jnp.asarray(np.linalg.qr(rng.randn(c, c))[0].astype(np.float32))

    def run_case(num_channels, h, w, n=2):
        weight = orthogonal_weight(num_channels, seed=num_channels)
        kx = jax.random.fold_in(key, num_channels * 10000 + h)
        x = jax.random.normal(kx, (n, num_channels, h, w), dtype=jnp.float32)
        logdet0 = jnp.zeros((n,), dtype=jnp.float32)

        # forward
        z, ld = invertible_conv1x1(x, weight, logdet=logdet0, reverse=False)
        z = jax.block_until_ready(z)
        ld = jax.block_until_ready(ld)

        z_ref = jnp.einsum("oc,nchw->nohw", weight, x)
        ld_ref = logdet0 + jnp.linalg.slogdet(weight)[1] * (h * w)
        assert jnp.allclose(z, z_ref, atol=1e-5, rtol=1e-5)
        assert jnp.allclose(ld, ld_ref, atol=1e-5, rtol=1e-5)

        # reverse reconstructs x and undoes the logdet update
        x_rec, ld_rec = invertible_conv1x1(z, weight, logdet=ld, reverse=True)
        x_rec = jax.block_until_ready(x_rec)
        assert jnp.allclose(x_rec, x, atol=1e-4, rtol=1e-4)
        assert jnp.allclose(ld_rec, logdet0, atol=1e-3, rtol=1e-4)

    # Tiny-C config from the module demo (SMEM/VPU path, batch-blocked grid).
    run_case(num_channels=4, h=16, w=16, n=2)
    # Slightly larger C (resident-weight MXU path).
    run_case(num_channels=8, h=16, w=16, n=2)
    # N=1 case: exercises the forced pixel-axis split (>= 2 grid programs).
    run_case(num_channels=8, h=32, w=32, n=1)

    print("KERNEL_OK")
</pallas_src>

<mosaic_0001>
module attributes {stable_mosaic.version = 11 : i64} {
  func.func @kernel(%arg0: i32, %arg1: i32, %arg2: memref<4x4xf32, #tpu.memory_space<smem>>, %arg3: memref<1x4x256xf32, #tpu.memory_space<vmem>>, %arg4: memref<1x4x256xf32, #tpu.memory_space<vmem>>) attributes {dimension_semantics = [#tpu.dimension_semantics<parallel>, #tpu.dimension_semantics<parallel>], iteration_bounds = array<i64: 2, 1>, scalar_prefetch = 0 : i64, scratch_operands = 0 : i64, tpu.core_type = #tpu.core_type<tc>, window_params = [{transform_indices = @transform_0, window_bounds = array<i64: 4, 4>}, {transform_indices = @transform_1, window_bounds = array<i64: 1, 4, 256>}, {transform_indices = @transform_2, window_bounds = array<i64: 1, 4, 256>}]} {
    %c0 = arith.constant 0 : index
    %c0_0 = arith.constant 0 : index
    %c0_1 = arith.constant 0 : index
    %0 = vector.load %arg3[%c0, %c0_0, %c0_1] : memref<1x4x256xf32, #tpu.memory_space<vmem>>, vector<1x4x256xf32>
    %c0_2 = arith.constant 0 : index
    %c0_3 = arith.constant 0 : index
    %1 = memref.load %arg2[%c0_2, %c0_3] : memref<4x4xf32, #tpu.memory_space<smem>>
    %2 = vector.extract_strided_slice %0 {offsets = [0, 0, 0], sizes = [1, 1, 256], strides = [1, 1, 1]} : vector<1x4x256xf32> to vector<1x1x256xf32>
    %3 = vector.broadcast %1 : f32 to vector<1x1x256xf32>
    %4 = arith.mulf %3, %2 : vector<1x1x256xf32>
    %c0_4 = arith.constant 0 : index
    %c1 = arith.constant 1 : index
    %5 = memref.load %arg2[%c0_4, %c1] : memref<4x4xf32, #tpu.memory_space<smem>>
    %6 = vector.extract_strided_slice %0 {offsets = [0, 1, 0], sizes = [1, 1, 256], strides = [1, 1, 1]} : vector<1x4x256xf32> to vector<1x1x256xf32>
    %7 = vector.broadcast %5 : f32 to vector<1x1x256xf32>
    %8 = arith.mulf %7, %6 : vector<1x1x256xf32>
    %9 = arith.addf %4, %8 : vector<1x1x256xf32>
    %c0_5 = arith.constant 0 : index
    %c2 = arith.constant 2 : index
    %10 = memref.load %arg2[%c0_5, %c2] : memref<4x4xf32, #tpu.memory_space<smem>>
    %11 = vector.extract_strided_slice %0 {offsets = [0, 2, 0], sizes = [1, 1, 256], strides = [1, 1, 1]} : vector<1x4x256xf32> to vector<1x1x256xf32>
    %12 = vector.broadcast %10 : f32 to vector<1x1x256xf32>
    %13 = arith.mulf %12, %11 : vector<1x1x256xf32>
    %14 = arith.addf %9, %13 : vector<1x1x256xf32>
    %c0_6 = arith.constant 0 : index
    %c3 = arith.constant 3 : index
    %15 = memref.load %arg2[%c0_6, %c3] : memref<4x4xf32, #tpu.memory_space<smem>>
    %16 = vector.extract_strided_slice %0 {offsets = [0, 3, 0], sizes = [1, 1, 256], strides = [1, 1, 1]} : vector<1x4x256xf32> to vector<1x1x256xf32>
    %17 = vector.broadcast %15 : f32 to vector<1x1x256xf32>
    %18 = arith.mulf %17, %16 : vector<1x1x256xf32>
    %19 = arith.addf %14, %18 : vector<1x1x256xf32>
    %c0_7 = arith.constant 0 : index
    %c0_8 = arith.constant 0 : index
    %c0_9 = arith.constant 0 : index
    %20 = vector.load %arg4[%c0_7, %c0_8, %c0_9] : memref<1x4x256xf32, #tpu.memory_space<vmem>>, vector<1x1x256xf32>
    tpu.vector_store %arg4[%c0_7, %c0_8, %c0_9], %19 {strides = array<i32>} : memref<1x4x256xf32, #tpu.memory_space<vmem>>, vector<1x1x256xf32>,
    %c1_10 = arith.constant 1 : index
    %c0_11 = arith.constant 0 : index
    %21 = memref.load %arg2[%c1_10, %c0_11] : memref<4x4xf32, #tpu.memory_space<smem>>
    %22 = vector.extract_strided_slice %0 {offsets = [0, 0, 0], sizes = [1, 1, 256], strides = [1, 1, 1]} : vector<1x4x256xf32> to vector<1x1x256xf32>
    %23 = vector.broadcast %21 : f32 to vector<1x1x256xf32>
    %24 = arith.mulf %23, %22 : vector<1x1x256xf32>
    %c1_12 = arith.constant 1 : index
    %c1_13 = arith.constant 1 : index
    %25 = memref.load %arg2[%c1_12, %c1_13] : memref<4x4xf32, #tpu.memory_space<smem>>
    %26 = vector.extract_strided_slice %0 {offsets = [0, 1, 0], sizes = [1, 1, 256], strides = [1, 1, 1]} : vector<1x4x256xf32> to vector<1x1x256xf32>
    %27 = vector.broadcast %25 : f32 to vector<1x1x256xf32>
    %28 = arith.mulf %27, %26 : vector<1x1x256xf32>
    %29 = arith.addf %24, %28 : vector<1x1x256xf32>
    %c1_14 = arith.constant 1 : index
    %c2_15 = arith.constant 2 : index
    %30 = memref.load %arg2[%c1_14, %c2_15] : memref<4x4xf32, #tpu.memory_space<smem>>
    %31 = vector.extract_strided_slice %0 {offsets = [0, 2, 0], sizes = [1, 1, 256], strides = [1, 1, 1]} : vector<1x4x256xf32> to vector<1x1x256xf32>
    %32 = vector.broadcast %30 : f32 to vector<1x1x256xf32>
    %33 = arith.mulf %32, %31 : vector<1x1x256xf32>
    %34 = arith.addf %29, %33 : vector<1x1x256xf32>
    %c1_16 = arith.constant 1 : index
    %c3_17 = arith.constant 3 : index
    %35 = memref.load %arg2[%c1_16, %c3_17] : memref<4x4xf32, #tpu.memory_space<smem>>
    %36 = vector.extract_strided_slice %0 {offsets = [0, 3, 0], sizes = [1, 1, 256], strides = [1, 1, 1]} : vector<1x4x256xf32> to vector<1x1x256xf32>
    %37 = vector.broadcast %35 : f32 to vector<1x1x256xf32>
    %38 = arith.mulf %37, %36 : vector<1x1x256xf32>
    %39 = arith.addf %34, %38 : vector<1x1x256xf32>
    %c0_18 = arith.constant 0 : index
    %c1_19 = arith.constant 1 : index
    %c0_20 = arith.constant 0 : index
    %40 = vector.load %arg4[%c0_18, %c1_19, %c0_20] : memref<1x4x256xf32, #tpu.memory_space<vmem>>, vector<1x1x256xf32>
    tpu.vector_store %arg4[%c0_18, %c1_19, %c0_20], %39 {strides = array<i32>} : memref<1x4x256xf32, #tpu.memory_space<vmem>>, vector<1x1x256xf32>,
    %c2_21 = arith.constant 2 : index
    %c0_22 = arith.constant 0 : index
    %41 = memref.load %arg2[%c2_21, %c0_22] : memref<4x4xf32, #tpu.memory_space<smem>>
    %42 = vector.extract_strided_slice %0 {offsets = [0, 0, 0], sizes = [1, 1, 256], strides = [1, 1, 1]} : vector<1x4x256xf32> to vector<1x1x256xf32>
    %43 = vector.broadcast %41 : f32 to vector<1x1x256xf32>
    %44 = arith.mulf %43, %42 : vector<1x1x256xf32>
    %c2_23 = arith.constant 2 : index
    %c1_24 = arith.constant 1 : index
    %45 = memref.load %arg2[%c2_23, %c1_24] : memref<4x4xf32, #tpu.memory_space<smem>>
    %46 = vector.extract_strided_slice %0 {offsets = [0, 1, 0], sizes = [1, 1, 256], strides = [1, 1, 1]} : vector<1x4x256xf32> to vector<1x1x256xf32>
    %47 = vector.broadcast %45 : f32 to vector<1x1x256xf32>
    %48 = arith.mulf %47, %46 : vector<1x1x256xf32>
    %49 = arith.addf %44, %48 : vector<1x1x256xf32>
    %c2_25 = arith.constant 2 : index
    %c2_26 = arith.constant 2 : index
    %50 = memref.load %arg2[%c2_25, %c2_26] : memref<4x4xf32, #tpu.memory_space<smem>>
    %51 = vector.extract_strided_slice %0 {offsets = [0, 2, 0], sizes = [1, 1, 256], strides = [1, 1, 1]} : vector<1x4x256xf32> to vector<1x1x256xf32>
    %52 = vector.broadcast %50 : f32 to vector<1x1x256xf32>
    %53 = arith.mulf %52, %51 : vector<1x1x256xf32>
    %54 = arith.addf %49, %53 : vector<1x1x256xf32>
    %c2_27 = arith.constant 2 : index
    %c3_28 = arith.constant 3 : index
    %55 = memref.load %arg2[%c2_27, %c3_28] : memref<4x4xf32, #tpu.memory_space<smem>>
    %56 = vector.extract_strided_slice %0 {offsets = [0, 3, 0], sizes = [1, 1, 256], strides = [1, 1, 1]} : vector<1x4x256xf32> to vector<1x1x256xf32>
    %57 = vector.broadcast %55 : f32 to vector<1x1x256xf32>
    %58 = arith.mulf %57, %56 : vector<1x1x256xf32>
    %59 = arith.addf %54, %58 : vector<1x1x256xf32>
    %c0_29 = arith.constant 0 : index
    %c2_30 = arith.constant 2 : index
    %c0_31 = arith.constant 0 : index
    %60 = vector.load %arg4[%c0_29, %c2_30, %c0_31] : memref<1x4x256xf32, #tpu.memory_space<vmem>>, vector<1x1x256xf32>
    tpu.vector_store %arg4[%c0_29, %c2_30, %c0_31], %59 {strides = array<i32>} : memref<1x4x256xf32, #tpu.memory_space<vmem>>, vector<1x1x256xf32>,
    %c3_32 = arith.constant 3 : index
    %c0_33 = arith.constant 0 : index
    %61 = memref.load %arg2[%c3_32, %c0_33] : memref<4x4xf32, #tpu.memory_space<smem>>
    %62 = vector.extract_strided_slice %0 {offsets = [0, 0, 0], sizes = [1, 1, 256], strides = [1, 1, 1]} : vector<1x4x256xf32> to vector<1x1x256xf32>
    %63 = vector.broadcast %61 : f32 to vector<1x1x256xf32>
    %64 = arith.mulf %63, %62 : vector<1x1x256xf32>
    %c3_34 = arith.constant 3 : index
    %c1_35 = arith.constant 1 : index
    %65 = memref.load %arg2[%c3_34, %c1_35] : memref<4x4xf32, #tpu.memory_space<smem>>
    %66 = vector.extract_strided_slice %0 {offsets = [0, 1, 0], sizes = [1, 1, 256], strides = [1, 1, 1]} : vector<1x4x256xf32> to vector<1x1x256xf32>
    %67 = vector.broadcast %65 : f32 to vector<1x1x256xf32>
    %68 = arith.mulf %67, %66 : vector<1x1x256xf32>
    %69 = arith.addf %64, %68 : vector<1x1x256xf32>
    %c3_36 = arith.constant 3 : index
    %c2_37 = arith.constant 2 : index
    %70 = memref.load %arg2[%c3_36, %c2_37] : memref<4x4xf32, #tpu.memory_space<smem>>
    %71 = vector.extract_strided_slice %0 {offsets = [0, 2, 0], sizes = [1, 1, 256], strides = [1, 1, 1]} : vector<1x4x256xf32> to vector<1x1x256xf32>
    %72 = vector.broadcast %70 : f32 to vector<1x1x256xf32>
    %73 = arith.mulf %72, %71 : vector<1x1x256xf32>
    %74 = arith.addf %69, %73 : vector<1x1x256xf32>
    %c3_38 = arith.constant 3 : index
    %c3_39 = arith.constant 3 : index
    %75 = memref.load %arg2[%c3_38, %c3_39] : memref<4x4xf32, #tpu.memory_space<smem>>
    %76 = vector.extract_strided_slice %0 {offsets = [0, 3, 0], sizes = [1, 1, 256], strides = [1, 1, 1]} : vector<1x4x256xf32> to vector<1x1x256xf32>
    %77 = vector.broadcast %75 : f32 to vector<1x1x256xf32>
    %78 = arith.mulf %77, %76 : vector<1x1x256xf32>
    %79 = arith.addf %74, %78 : vector<1x1x256xf32>
    %c0_40 = arith.constant 0 : index
    %c3_41 = arith.constant 3 : index
    %c0_42 = arith.constant 0 : index
    %80 = vector.load %arg4[%c0_40, %c3_41, %c0_42] : memref<1x4x256xf32, #tpu.memory_space<vmem>>, vector<1x1x256xf32>
    tpu.vector_store %arg4[%c0_40, %c3_41, %c0_42], %79 {strides = array<i32>} : memref<1x4x256xf32, #tpu.memory_space<vmem>>, vector<1x1x256xf32>,
    return
  }
  func.func @transform_0(%arg0: i32, %arg1: i32) -> (i32, i32) {
    %c0_i32 = arith.constant 0 : i32
    %c0_i32_0 = arith.constant 0 : i32
    %c0_i32_1 = arith.constant 0 : i32
    return %c0_i32, %c0_i32_0 : i32, i32
  }
  func.func @transform_1(%arg0: i32, %arg1: i32) -> (i32, i32, i32) {
    %c0_i32 = arith.constant 0 : i32
    %c0_i32_0 = arith.constant 0 : i32
    return %arg0, %c0_i32, %arg1 : i32, i32, i32
  }
  func.func @transform_2(%arg0: i32, %arg1: i32) -> (i32, i32, i32) {
    %c0_i32 = arith.constant 0 : i32
    %c0_i32_0 = arith.constant 0 : i32
    return %arg0, %c0_i32, %arg1 : i32, i32, i32
  }
}

</mosaic_0001>

<bundles_post_ra>
// kernel: tpu_custom_call.1
= control target key start
LH: loop header
LB: loop body
LE: loop exit
PB: predicated region body
PF: predicated region fallthrough
CT: control target
= control target key end

     0   :  { %7 = vsyncpa [#allocation5], 0  ;;  %s1043_s0 = inlined_call_operand.hbm [shape: f32[4,4], index: 0, kind: input, shape index: {}]   ;;  %s1044_s1 = inlined_call_operand.hbm [shape: f32[2,4,256], index: 1, kind: input, shape index: {}]   ;;  %s1045_s2 = inlined_call_operand.hbm [shape: f32[2,4,256], index: 2, kind: output, shape index: {}]  }
   0x1   :  { %8 = vsyncpa [#allocation3], 0 }
   0x2   :  { %10 = vsyncpa [#allocation3 + $0x1], 0 }
   0x3   :  { %11 = vsyncpa [#allocation4], 0 }
   0x4   :  { %13 = vsyncpa [#allocation4 + $0x1], 0  ;;  %s762_s9 = smov 0   ;;  %s764_s10 = smov 0  }
   0x5   :  { %s766_s11 = smov 0   ;;  %s768_s12 = smov 0  }
   0x6   :  { %s770_s13 = smov 0   ;;  %s772_s14 = smov 0  }
   0x7 LB: > { %s489_s15 = sadd.s32 4294967295, %s741_s14   ;;  %s490_s16 = sadd.s32 4294967294, %s741_s14   ;;  %s741_s14 = sphi %s772_s14, %s19_s14   ;;  %s737_s13 = sphi %s770_s13, %s1071_s13   ;;  %s733_s12 = sphi %s768_s12, %s1070_s12   ;;  %s729_s11 = sphi %s766_s11, %s1069_s11   ;;  %s725_s10 = sphi %s764_s10, %s1068_s10   ;;  %s721_s9 = sphi %s762_s9, %s1067_s9  }
   0x8   : > { %p74_p0 = scmp.ne.s32.totalorder %s725_s10, %s721_s9  ;;  %p796_p1 = scmp.eq.s32.totalorder %s489_s15, 0 }
   0x9   : > { %p800_p2 = scmp.eq.s32.totalorder %s489_s15, 1  ;;  %p106_p3 = scmp.eq.s32.totalorder %s490_s16, 1 }
   0xa   : > { %s1050_s17 = scalar_select %p796_p1, 1, 0 }
   0xb   : > { %p806_p4 = por %p796_p1, %p74_p0  ;;  %p491_p5 = scmp.ge.s32.totalorder %s741_s14, 1 }
   0xc   : > { %p811_p6 = por %p106_p3, %p74_p0  ;;  %p113_p7 = scmp.lt.s32.totalorder %s741_s14, 3 }
   0xd   : > { %s1052_s19 = scalar_select %p806_p4, 1, 0 }
   0xe   : > { %s1053_s20 = scalar_select %p811_p6, 1, 0 }
   0xf   : > { %p816_p8 = pnand %p491_p5, %p113_p7  ;;  %s31_s22 = sadd.s32 1, %s737_s13 }
  0x10   : > { %p830_p12 = scmp.ge.s32.totalorder %s31_s22, 2  ;;  %s61_s25 = sadd.s32 1, %s729_s11 }
  0x11   : > { %p546_p10 = pneg %p816_p8  ;;  %p68_p13 = scmp.ne.s32.totalorder %s729_s11, %s725_s10 }
  0x12   : > { %p69_p0 = scmp.eq.s32.totalorder %s741_s14, 0  ;;  %s612_s28 = scalar_lea.hbm %s1043_s0, 64 }
  0x13   : > { %p826_p11 = pnand %p546_p10, %p796_p1  ;;  %p613_p3 = scmp.ne.s32.totalorder %s1043_s0, %s612_s28 }
  0x14   : > { %p619_p9 = scmp.lt.u32.totalorder %s612_s28, %s1043_s0 }
  0x15   : > { %p614_p5 = pneg %p826_p11 }
  0x17   : > { %p615_p7 = pnand %p614_p5, %p613_p3 }
  0x19   : > { %p616_p10 = pneg %p615_p7 }
  0x1b   : > { %p621_p6 = pnand %p619_p9, %p616_p10 }
  0x1d   : > { %624 = shalt.err (!%p621_p6)
}
  0x1e   : > { %s743_s5 = smov [#allocation2]   ;;  %s1073_s22 = smov (%p830_p12, %s31_s22), 0 }
  0x1f   : > { %549 = dma.hbm_to_smem (!%p826_p11), %s1043_s0, 64, %s743_s5, [#allocation5]  }
  0x20   : > { %p861_p6 = por %p69_p0, %p68_p13  ;;  %p870_p9 = por %p800_p2, %p68_p13 }
  0x21   : > { %s56_s16 = ssub.s32 %s737_s13, %s1073_s22  ;;  %p559_p3 = scmp.lt.s32.totalorder %s741_s14, 2 }
  0x22   : > { %s1058_s15 = scalar_select %p870_p9, 1, 0 }
  0x23   : > { %p59_p5 = scmp.eq.s32.totalorder %s56_s16, 0  ;;  %s135_s23 = sand.u32 1, %s729_s11  }
  0x24   : > { %s494_s24 = sshll.u32 %s135_s23, 3  ;;  %s536_s27 = sshll.u32 %s737_s13, 7 }
  0x25   : > { %s879_s26 = scalar_select %p59_p5, %s729_s11, %s61_s25  }
  0x26   : > { %s885_s30 = scalar_lea.hbm %s1044_s1, %s536_s27  ;;  %s139_s18 = scalar_lea.vmem [#allocation6], %s494_s24 }
  0x27   : > { %s149_s3 = sshll.u32 %s139_s18, 4  ;;  %p891_p2 = pnand %p559_p3, %p861_p6  ;;  %s887_s3 = int_to_ptr.vmem [resolvable:$true] %s149_s3 }
  0x28   : > { %s136_s25 = scalar_lea.sflag [#allocation3], %s135_s23  ;;  %s625_s5 = scalar_lea.hbm %s885_s30, 128 }
  0x29   : > { %p626_p11 = scmp.ne.s32.totalorder %s885_s30, %s625_s5  ;;  %p627_p12 = pneg %p891_p2 }
  0x2a   : > { %s630_s16 = scalar_lea.hbm %s1044_s1, 256  ;;  %p631_p7 = scmp.lt.u32.totalorder %s885_s30, %s1044_s1 }
  0x2b   : > { %p628_p13 = pnand %p627_p12, %p626_p11  ;;  %p632_p10 = scmp.lt.u32.totalorder %s630_s16, %s625_s5 }
  0x2c   : > { %p634_p3 = scmp.lt.u32.totalorder %s625_s5, %s885_s30 }
  0x2d   : > { %p629_p0 = pneg %p628_p13  ;;  %p633_p6 = por %p632_p10, %p631_p7 }
  0x2f   : > { %p635_p5 = por %p634_p3, %p633_p6 }
  0x31   : > { %p636_p9 = pnand %p635_p5, %p629_p0 }
  0x33   : > { %639 = shalt.err (!%p636_p9)
}
  0x34   : > { %s640_s23 = scalar_lea.vmem %s887_s3, 128  ;;  %s744_s27 = smov [#allocation6]  }
  0x35   : > { %p641_p11 = scmp.ne.s32.totalorder %s887_s3, %s640_s23  ;;  %s645_s28 = sshll.u32 %s744_s27, 4  ;;  %s646_s28 = int_to_ptr.vmem [resolvable:$false] %s645_s28 }
  0x36   : > { %s647_s29 = scalar_lea.vmem %s646_s28, 256  ;;  %p648_p1 = scmp.lt.s32.totalorder %s887_s3, %s646_s28 }
  0x37   : > { %p643_p13 = pnand %p641_p11, %p627_p12  ;;  %p649_p7 = scmp.lt.s32.totalorder %s647_s29, %s640_s23 }
  0x39   : > { %p644_p4 = pneg %p643_p13  ;;  %p650_p10 = por %p649_p7, %p648_p1 }
  0x3b   : > { %p651_p6 = pnand %p650_p10, %p644_p4 }
  0x3d   : > { %654 = shalt.err (!%p651_p6)
}
  0x3e   : > { %553 = dma.hbm_to_vmem [thread:$0]  (!%p891_p2), %s885_s30, 128, %s887_s3, %s136_s25  }
  0x3f   : > { %158 = sbr.rel (%p816_p8) target bundleno = 122 (0x7a), region = 28  ;;  %p1060_p9 = scmp.ne.s32.totalorder (!%p816_p8), %s1050_s17, 0 }
  0x46   : > { %708 = dma.done.wait (%p1060_p9), [#allocation5], 64  }
  0x47   : > { %710 = vsyncadd (%p1060_p9), [#allocation5], 4294967232  ;;  %s927_s18 = sand.u32 1, %s725_s10   ;;  %p1061_p1 = scmp.ne.s32.totalorder %s1052_s19, 0 }
  0x48   : > { %s499_s4 = sshll.u32 %s927_s18, 3  ;;  %s165_s5 = scalar_lea.sflag [#allocation3], %s927_s18 }
  0x49   : > { %s168_s30 = scalar_lea.vmem [#allocation6], %s499_s4 }
  0x4a   : > { %712 = dma.done.wait (%p1061_p1), %s165_s5, 128  }
  0x4b   : > { %714 = vsyncadd (%p1061_p1), %s165_s5, 4294967168 }
  0x4c   : > { %173 = sfence }
  0x4d   : > { %s193_s21 = sld [smem:[#allocation2]]  ;;  %v224_v0 = vlaneseq  ;;  %s501_s17 = sld [smem:[#allocation2 + $0x1]]  ;;  %v745_v1 = vmov 1966171168   ;;  %v192_v5 = vld [vmem:[%s168_s30] sm:$0xff] }
  0x4e   : > { %s503_s3 = sld [smem:[#allocation2 + $0x2]]  ;;  %v222_v2 = vunpack.c.l.s4 %v745_v1  ;;  %s505_s25 = sld [smem:[#allocation2 + $0x3]] }
  0x4f   : > { %s507_s6 = sld [smem:[#allocation2 + $0x80]]  ;;  %v225_v4 = vshrl.u32 %v224_v0, 7  ;;  %s508_s7 = sld [smem:[#allocation2 + $0x81]]  ;;  %vm969_vm0 = vcmp.lt.s32.totalorder %v224_v0, 256 }
  0x50   : > { %v223_v3 = vunpack.c.0.s8 %v222_v2  ;;  %s510_s16 = sld [smem:[#allocation2 + $0x82]]  ;;  %s938_s8 = sld [smem:[#allocation2 + $0x83]] }
  0x51   : > { %s940_s24 = sld [smem:[#allocation2 + $0x100]]  ;;  %s942_s19 = sld [smem:[#allocation2 + $0x101]] }
  0x52   : > { %s944_s23 = sld [smem:[#allocation2 + $0x102]]  ;;  %s946_s27 = sld [smem:[#allocation2 + $0x103]]  ;;  %v948_v10 = vsub.s32 %v223_v3, %v225_v4 }
  0x53   : > { %v194_v6 = vstv %s193_s21  ;;  %v197_v8 = vstv %s501_s17  ;;  %s950_s28 = sld [smem:[#allocation2 + $0x180]]  ;;  %s952_s29 = sld [smem:[#allocation2 + $0x181]] }
  0x54   : > { %v195_v7 = vmul.f32 %v194_v6, %v192_v5  ;;  %v205_v9 = vstv %s503_s3  ;;  %v198_v11 = vmul.f32 %v197_v8, %v192_v5  ;;  %v213_v13 = vstv %s505_s25  ;;  %s954_s5 = sld [smem:[#allocation2 + $0x182]]  ;;  %s956_s30 = sld [smem:[#allocation2 + $0x183]] }
  0x55   : > { %v206_v12 = vmul.f32 %v205_v9, %v192_v5  ;;  %v242_v14 = vstv %s507_s6  ;;  %v214_v15 = vmul.f32 %v213_v13, %v192_v5  ;;  %v245_v17 = vstv %s508_s7  ;;  %s189_s21 = scalar_lea.vmem [#allocation7], %s499_s4  ;;  %s537_s17 = sshll.u32 %s733_s12, 7 }
  0x56   : > { %v243_v16 = vmul.f32 %v242_v14, %v192_v5  ;;  %v253_v18 = vstv %s510_s16  ;;  %v502_v19 = vrot.slane %v198_v11, 9  ;;  %v246_v21 = vmul.f32 %v245_v17, %v192_v5  ;;  %s393_s3 = sshll.u32 %s189_s21, 4  ;;  %s992_s6 = scalar_lea.hbm %s1045_s2, %s537_s17  ;;  %s994_s3 = int_to_ptr.vmem [resolvable:$true] %s393_s3 }
  0x57   : > { %v504_v20 = vrot.slane %v206_v12, 10  ;;  %v254_v22 = vmul.f32 %v253_v18, %v192_v5  ;;  %v506_v23 = vrot.slane %v214_v15, 11  ;;  %v261_v24 = vstv %s938_s8  ;;  %s377_s12 = scalar_lea.sflag [#allocation4], %s927_s18  ;;  %s655_s7 = scalar_lea.vmem %s994_s3, 128 }
  0x58   : > { %v287_v25 = vstv %s940_s24  ;;  %v290_v26 = vstv %s942_s19  ;;  %v203_v27 = vadd.f32 %v502_v19, %v195_v7  ;;  %v509_v28 = vrot.slane %v246_v21, 9  ;;  %p656_p4 = scmp.ne.s32.totalorder %s994_s3, %s655_s7  ;;  %p1064_p8 = scmp.ne.s32.totalorder %s1058_s15, 0 }
  0x59   : > { %v511_v29 = vrot.slane %v254_v22, 10  ;;  %v262_v30 = vmul.f32 %v261_v24, %v192_v5  ;;  %v288_v31 = vmul.f32 %v287_v25, %v192_v5  ;;  %v291_v32 = vmul.f32 %v290_v26, %v192_v5  ;;  %s746_s16 = smov [#allocation7]  }
  0x5a   : > { %v298_v33 = vstv %s944_s23  ;;  %v306_v34 = vstv %s946_s27  ;;  %v211_v35 = vadd.f32 %v504_v20, %v203_v27  ;;  %v251_v36 = vadd.f32 %v509_v28, %v243_v16  ;;  %p657_p2 = pnand %p656_p4, %p1064_p8  ;;  %s659_s8 = sshll.u32 %s746_s16, 4  ;;  %s660_s8 = int_to_ptr.vmem [resolvable:$false] %s659_s8 }
  0x5b   : > { %v513_v37 = vrot.slane %v262_v30, 11  ;;  %v299_v38 = vmul.f32 %v298_v33, %v192_v5  ;;  %v517_v39 = vrot.slane %v291_v32, 9  ;;  %v307_v40 = vmul.f32 %v306_v34, %v192_v5  ;;  %s661_s24 = scalar_lea.vmem %s660_s8, 256  ;;  %p662_p0 = scmp.lt.s32.totalorder %s994_s3, %s660_s8 }
  0x5c   : > { %v332_v41 = vstv %s950_s28  ;;  %v335_v42 = vstv %s952_s29  ;;  %v219_v43 = vadd.f32 %v506_v23, %v211_v35  ;;  %v259_v44 = vadd.f32 %v511_v29, %v251_v36  ;;  %p658_p12 = pneg %p657_p2  ;;  %p663_p3 = scmp.lt.s32.totalorder %s661_s24, %s655_s7 }
  0x5d   : > { %v519_v45 = vrot.slane %v299_v38, 10  ;;  %v333_v46 = vmul.f32 %v332_v41, %v192_v5  ;;  %v296_v47 = vadd.f32 %v517_v39, %v288_v31  ;;  %v521_v48 = vrot.slane %v307_v40, 11 }
  0x5e   : > { %v336_v49 = vmul.f32 %v335_v42, %v192_v5  ;;  %v343_v50 = vstv %s954_s5  ;;  %v227_v51 = vrot.slane %v219_v43, %v948_v10  ;;  %v267_v52 = vadd.f32 %v513_v37, %v259_v44  ;;  %p664_p5 = por %p663_p3, %p662_p0 }
  0x5f   : > { %v344_v53 = vmul.f32 %v343_v50, %v192_v5  ;;  %v351_v54 = vstv %s956_s30  ;;  %v304_v56 = vadd.f32 %v519_v45, %v296_v47 }
  0x60   : > { %v525_v57 = vrot.slane %v336_v49, 9  ;;  %v352_v58 = vmul.f32 %v351_v54, %v192_v5  ;;  %v234_v59 = vrot.slane %v227_v51, %v948_v10  ;;  %v275_v60 = vrot.slane %v267_v52, %v948_v10  ;;  %p665_p11 = pnand %p664_p5, %p658_p12 }
  0x61   : > { %v527_v61 = vrot.slane %v344_v53, 10  ;;  %v312_v62 = vadd.f32 %v521_v48, %v304_v56 }
  0x62   : > { %v341_v63 = vadd.f32 %v525_v57, %v333_v46  ;;  %v529_v1 = vrot.slane %v352_v58, 11  ;;  %240 = vst.msk [vmem:[%s189_s21] ss:$4 sm:$0x3] %vm969_vm0, %v234_v59  ;;  %v282_v0 = vrot.slane %v275_v60, %v948_v10 }
  0x63   : > { %v320_v2 = vrot.slane %v312_v62, %v948_v10 }
  0x64   : > { %v349_v3 = vadd.f32 %v527_v61, %v341_v63  ;;  %514 = vst.msk [vmem:[%s189_s21 + $0x1] ss:$4 sm:$0x3] %vm969_vm0, %v282_v0 }
  0x65   : > { %v327_v4 = vrot.slane %v320_v2, %v948_v10 }
  0x66   : > { %v357_v5 = vadd.f32 %v529_v1, %v349_v3 }
  0x67   : > { %522 = vst.msk [vmem:[%s189_s21 + $0x2] ss:$4 sm:$0x3] %vm969_vm0, %v327_v4 }
  0x68   : > { %v365_v6 = vrot.slane %v357_v5, %v948_v10 }
  0x6a   : > { %v372_v7 = vrot.slane %v365_v6, %v948_v10 }
  0x6c   : > { %530 = vst.msk [vmem:[%s189_s21 + $0x3] ss:$4 sm:$0x3] %vm969_vm0, %v372_v7 }
  0x6d   : > { %668 = shalt.err (!%p665_p11)
}
  0x6e   : > { %s669_s18 = scalar_lea.hbm %s992_s6, 128  ;;  %s673_s27 = scalar_lea.hbm %s1045_s2, 256 }
  0x6f   : > { %p670_p13 = scmp.ne.s32.totalorder %s992_s6, %s669_s18  ;;  %p674_p6 = scmp.lt.u32.totalorder %s992_s6, %s1045_s2 }
  0x70   : > { %p675_p9 = scmp.lt.u32.totalorder %s673_s27, %s669_s18  ;;  %p677_p4 = scmp.lt.u32.totalorder %s669_s18, %s992_s6 }
  0x71   : > { %p671_p7 = pnand %p670_p13, %p1064_p8 }
  0x72   : > { %p676_p1 = por %p675_p9, %p674_p6 }
  0x73   : > { %p672_p10 = pneg %p671_p7 }
  0x74   : > { %p678_p2 = por %p677_p4, %p676_p1 }
  0x76   : > { %p679_p12 = pnand %p678_p2, %p672_p10 }
  0x78   : > { %682 = shalt.err (!%p679_p12)
}
  0x79   : > { %544 = dma.vmem_to_hbm [thread:$0]  (%p1064_p8), %s994_s3, 128, %s992_s6, %s377_s12  }
  0x7a PF: > { %s405_s5 = sand.u32 1, %s721_s9   ;;  %p1065_p0 = scmp.ne.s32.totalorder %s1053_s20, 0 }
  0x7b   : > { %p1066_p3 = scmp.ge.s32.totalorder %s741_s14, 2  ;;  %s406_s30 = scalar_lea.sflag [#allocation4], %s405_s5 }
  0x7d   : > { %p555_p5 = pnand %p1066_p3, %p1065_p0 }
  0x7f   : > { %716 = dma.done.wait (!%p555_p5), %s406_s30, 128  }
  0x80   : > { %718 = vsyncadd (!%p555_p5), %s406_s30, 4294967168  ;;  %s19_s14 = sadd.s32 1, %s741_s14   ;;  %s1067_s9 = smov %s725_s10 }
  0x81   : > { %p16_p11 = scmp.ge.s32.totalorder %s19_s14, 4   ;;  %s1068_s10 = smov %s729_s11 }
  0x82   : > { %s1069_s11 = smov %s879_s26  ;;  %s1070_s12 = smov %s737_s13 }
  0x83   : > { %s1071_s13 = smov %s1073_s22  ;;  %18 = sbr.rel (!%p16_p11) target bundleno = 7 (0x7), region = 81 }
  0x8a   :  { %411 = vsyncpa [#allocation3], 1 }
  0x8b   :  { %413 = vsyncpa [#allocation3 + $0x1], 1 }
  0x8c   :  { %414 = vsyncpa [#allocation4], 1 }
  0x8d   :  { %416 = vsyncpa [#allocation4 + $0x1], 1 }
  0x8e   :  { %417 = vsyncpa [#allocation5], 1 }
  0x8f   :  { %419 = vsyncpa [#allocation5 + $0x1], 1 }

</bundles_post_ra>
